<compile_context>
chip_gen: v7x
topology: tpu7x:2x2x1
jax: 0.10.0
libtpu: 0.0.40
codegen_flags: <defaults>
</compile_context>

<pallas_src>
import functools

import jax
import jax.numpy as jnp
from jax.experimental import pallas as pl
from jax.experimental.pallas import tpu as pltpu

LANES = 128          # lane width
SMALL_N = 1 << 20    # below this, fused XLA beats a kernel launch


@functools.lru_cache(maxsize=None)
def _device_kind():
    try:
        return jax.devices()[0].device_kind.lower()
    except Exception:
        return ""


def _is_v7():
    return "v7" in _device_kind()


def _tm_max():
    # >= 1 MiB per input block everywhere; 2 MiB on v7x where the ~0.35 us
    # per-grid-step overhead is a larger fraction of the per-TC HBM stream.
    return 4096 if _is_v7() else 2048


def _num_shards():
    # Only v7x has 2 TensorCores worth sharding across; v5e/v6e have 1 TC.
    return 2 if _is_v7() else 1


def _mse_kernel(x_ref, y_ref, o_ref, *, rows, tm, tiles_per_core, masked):
    c = pl.program_id(0)   # partial-sum shard (one per TensorCore on v7x)
    i = pl.program_id(1)   # tile index within the shard (reduction axis)

    @pl.when(i == 0)
    def _():
        o_ref[...] = jnp.zeros_like(o_ref)

    x = x_ref[...].astype(jnp.float32)
    y = y_ref[...].astype(jnp.float32)
    d = x - y

    def accumulate(dd):
        # (tm,128)->(tm//8,8,128) is layout-preserving; the axis-0 sum is
        # tm//8 - 1 plain vreg adds (VPU only), accumulated into the
        # VMEM-resident output block.
        o_ref[...] += jnp.sum((dd * dd).reshape(tm // 8, 8, LANES),
                              axis=0)[None]

    if not masked:
        accumulate(d)
    else:
        tile = c * tiles_per_core + i
        # Only the ragged last tile / clamped out-of-range tiles pay for the
        # iota + compare + select; interior tiles run only sub/mul/add.
        needs_mask = (tile + 1) * tm > rows

        @pl.when(jnp.logical_not(needs_mask))
        def _():
            accumulate(d)

        @pl.when(needs_mask)
        def _():
            local_row = jax.lax.broadcasted_iota(jnp.int32, (tm, LANES), 0)
            valid = (tile * tm + local_row) < rows
            # Mask BEFORE squaring so garbage (inf/NaN) in out-of-bounds rows
            # can never poison the accumulator.
            accumulate(jnp.where(valid, d, 0.0))


def _sum_sq_diff_pallas(x2d, y2d, rows):
    """Sum of (x - y)^2 over a (rows, 128) slab, rows >= 8."""
    # Tile rows: multiple of 8, never larger than the array (so only standard
    # partial boundary blocks occur), capped at >= 1 MiB per input block.
    tm = min(_tm_max(), (rows // 8) * 8)
    num_tiles = (rows + tm - 1) // tm
    nc = max(1, min(_num_shards(), num_tiles))
    tiles_per_core = (num_tiles + nc - 1) // nc

    aligned = (rows % tm == 0) and (num_tiles % nc == 0)
    if aligned:
        in_map = lambda c, i: (c * tiles_per_core + i, 0)
    else:
        # Clamp so the DMA never walks past the array; logically out-of-range
        # tiles are fully masked inside the kernel.
        in_map = lambda c, i: (jnp.minimum(c * tiles_per_core + i,
                                           num_tiles - 1), 0)

    kernel = functools.partial(
        _mse_kernel, rows=rows, tm=tm, tiles_per_core=tiles_per_core,
        masked=not aligned)

    in_specs = [pl.BlockSpec((tm, LANES), in_map),
                pl.BlockSpec((tm, LANES), in_map)]
    out_spec = pl.BlockSpec((1, 8, LANES), lambda c, i: (c, 0, 0))

    def run(semantics):
        return pl.pallas_call(
            kernel,
            out_shape=jax.ShapeDtypeStruct((nc, 8, LANES), jnp.float32),
            grid_spec=pltpu.PrefetchScalarGridSpec(
                num_scalar_prefetch=0,
                grid=(nc, tiles_per_core),
                in_specs=in_specs,
                out_specs=out_spec,
            ),
            compiler_params=pltpu.CompilerParams(
                dimension_semantics=semantics),
        )(x2d, y2d)

    if nc > 1:
        # v7x: the shard axis only buys throughput if it is split across the
        # 2 TensorCores; try CORE_PARALLEL and fall back to plain "parallel".
        core_parallel = getattr(pltpu, "CORE_PARALLEL", "parallel")
        arbitrary = getattr(pltpu, "ARBITRARY", "arbitrary")
        try:
            partials = run((core_parallel, arbitrary))
        except Exception:
            partials = run(("parallel", "arbitrary"))
    else:
        partials = run(("parallel", "arbitrary"))

    return jnp.sum(partials)


def log_loss(inputs, target, *, use_pallas=None):
    """mean((inputs - target)**2) over all elements (== LogLoss.forward)."""
    assert inputs.shape == target.shape
    n = inputs.size
    if n == 0:
        return jnp.float32(0.0)

    if use_pallas is None:
        use_pallas = n >= SMALL_N

    if not use_pallas:
        d = inputs.astype(jnp.float32) - target.astype(jnp.float32)
        return jnp.sum(d * d) * jnp.float32(1.0 / n)

    x = inputs.reshape(-1)
    y = target.reshape(-1)

    # 128-aligned prefix goes through the kernel; everything else (the ragged
    # < 128-element tail, or the whole thing if there are fewer than 8 full
    # rows) is a tiny jnp reduction -- no full-array jnp.pad copy.
    n_main = (n // LANES) * LANES
    rows = n_main // LANES
    if rows < 8:          # too small to tile; handle entirely below
        n_main = 0
        rows = 0

    total = jnp.float32(0.0)
    if n_main < n:
        dt = x[n_main:].astype(jnp.float32) - y[n_main:].astype(jnp.float32)
        total = total + jnp.sum(dt * dt)

    if rows > 0:
        xs = x if n_main == n else x[:n_main]
        ys = y if n_main == n else y[:n_main]
        x2d = xs.reshape(rows, LANES)
        y2d = ys.reshape(rows, LANES)
        total = total + _sum_sq_diff_pallas(x2d, y2d, rows)

    return total * jnp.float32(1.0 / n)


if __name__ == "__main__":
    key = jax.random.PRNGKey(0)
    k1, k2, k3, k4 = jax.random.split(key, 4)

    # Case 1: lane-aligned NCHW-like activations (2*4*16*16 = 2048 elements).
    shape1 = (2, 4, 16, 16)
    # Values kept strictly positive (the module applies log(x/10) internally,
    # though that intermediate is dead code and never affects the output).
    a1 = jax.random.uniform(k1, shape1, dtype=jnp.float32, minval=0.5, maxval=5.0)
    b1 = jax.random.uniform(k2, shape1, dtype=jnp.float32, minval=0.5, maxval=5.0)
    out1 = log_loss(a1, b1, use_pallas=True)      # force the Pallas path
    jax.block_until_ready(out1)
    ref1 = jnp.mean((a1 - b1) ** 2)
    assert jnp.allclose(out1, ref1, rtol=1e-5, atol=1e-6), (out1, ref1)

    # Case 2: non-128-multiple element count exercises the masked last tile
    # and the out-of-kernel tail (3*5*7*11 = 1155 -> 1152 in-kernel + 3 tail).
    shape2 = (3, 5, 7, 11)
    a2 = jax.random.uniform(k3, shape2, dtype=jnp.float32, minval=0.5, maxval=5.0)
    b2 = jax.random.uniform(k4, shape2, dtype=jnp.float32, minval=0.5, maxval=5.0)
    out2 = log_loss(a2, b2, use_pallas=True)
    jax.block_until_ready(out2)
    ref2 = jnp.mean((a2 - b2) ** 2)
    assert jnp.allclose(out2, ref2, rtol=1e-5, atol=1e-6), (out2, ref2)

    # Case 3: default (auto) dispatch -- small inputs take the XLA fast path.
    out3 = log_loss(a1, b1)
    jax.block_until_ready(out3)
    assert jnp.allclose(out3, ref1, rtol=1e-5, atol=1e-6), (out3, ref1)

    print("KERNEL_OK")
</pallas_src>

<mosaic_0001>
module attributes {stable_mosaic.version = 11 : i64} {
  func.func @_mse_kernel(%arg0: i32, %arg1: i32, %arg2: memref<16x128xf32, #tpu.memory_space<vmem>>, %arg3: memref<16x128xf32, #tpu.memory_space<vmem>>, %arg4: memref<1x8x128xf32, #tpu.memory_space<vmem>>) attributes {dimension_semantics = [#tpu.dimension_semantics<parallel>, #tpu.dimension_semantics<arbitrary>], iteration_bounds = array<i64: 1, 1>, scalar_prefetch = 0 : i64, scratch_operands = 0 : i64, tpu.core_type = #tpu.core_type<tc>, window_params = [{transform_indices = @transform_0, window_bounds = array<i64: 16, 128>}, {transform_indices = @transform_1, window_bounds = array<i64: 16, 128>}, {transform_indices = @transform_2, window_bounds = array<i64: 1, 8, 128>}]} {
    %c0_i32 = arith.constant 0 : i32
    %0 = arith.cmpi eq, %arg1, %c0_i32 : i32
    %1 = arith.extui %0 : i1 to i32
    %c0_i32_0 = arith.constant 0 : i32
    %2 = arith.cmpi ne, %1, %c0_i32_0 : i32
    scf.if %2 {
      %cst_10 = arith.constant 0.000000e+00 : f32
      %13 = vector.broadcast %cst_10 : f32 to vector<1x8x128xf32>
      %c0_11 = arith.constant 0 : index
      %c0_12 = arith.constant 0 : index
      %c0_13 = arith.constant 0 : index
      %14 = vector.load %arg4[%c0_11, %c0_12, %c0_13] : memref<1x8x128xf32, #tpu.memory_space<vmem>>, vector<1x8x128xf32>
      tpu.vector_store %arg4[%c0_11, %c0_12, %c0_13], %13 {strides = array<i32>} : memref<1x8x128xf32, #tpu.memory_space<vmem>>, vector<1x8x128xf32>,
    } else {
    }
    %c0 = arith.constant 0 : index
    %c0_1 = arith.constant 0 : index
    %3 = vector.load %arg2[%c0, %c0_1] : memref<16x128xf32, #tpu.memory_space<vmem>>, vector<16x128xf32>
    %c0_2 = arith.constant 0 : index
    %c0_3 = arith.constant 0 : index
    %4 = vector.load %arg3[%c0_2, %c0_3] : memref<16x128xf32, #tpu.memory_space<vmem>>, vector<16x128xf32>
    %5 = arith.subf %3, %4 : vector<16x128xf32>
    %c0_4 = arith.constant 0 : index
    %c0_5 = arith.constant 0 : index
    %c0_6 = arith.constant 0 : index
    %6 = vector.load %arg4[%c0_4, %c0_5, %c0_6] : memref<1x8x128xf32, #tpu.memory_space<vmem>>, vector<1x8x128xf32>
    %7 = arith.mulf %5, %5 : vector<16x128xf32>
    %8 = vector.shape_cast %7 : vector<16x128xf32> to vector<2x8x128xf32>
    %cst = arith.constant dense<0.000000e+00> : vector<8x128xf32>
    %9 = vector.multi_reduction <add>, %8, %cst [0] : vector<2x8x128xf32> to vector<8x128xf32>
    %10 = vector.shape_cast %9 : vector<8x128xf32> to vector<1x8x128xf32>
    %11 = arith.addf %6, %10 : vector<1x8x128xf32>
    %c0_7 = arith.constant 0 : index
    %c0_8 = arith.constant 0 : index
    %c0_9 = arith.constant 0 : index
    %12 = vector.load %arg4[%c0_7, %c0_8, %c0_9] : memref<1x8x128xf32, #tpu.memory_space<vmem>>, vector<1x8x128xf32>
    tpu.vector_store %arg4[%c0_7, %c0_8, %c0_9], %11 {strides = array<i32>} : memref<1x8x128xf32, #tpu.memory_space<vmem>>, vector<1x8x128xf32>,
    return
  }
  func.func @transform_0(%arg0: i32, %arg1: i32) -> (i32, i32) {
    %c1_i32 = arith.constant 1 : i32
    %0 = arith.muli %arg0, %c1_i32 : i32
    %1 = arith.addi %0, %arg1 : i32
    %c0_i32 = arith.constant 0 : i32
    %c0_i32_0 = arith.constant 0 : i32
    return %1, %c0_i32 : i32, i32
  }
  func.func @transform_1(%arg0: i32, %arg1: i32) -> (i32, i32) {
    %c1_i32 = arith.constant 1 : i32
    %0 = arith.muli %arg0, %c1_i32 : i32
    %1 = arith.addi %0, %arg1 : i32
    %c0_i32 = arith.constant 0 : i32
    %c0_i32_0 = arith.constant 0 : i32
    return %1, %c0_i32 : i32, i32
  }
  func.func @transform_2(%arg0: i32, %arg1: i32) -> (i32, i32, i32) {
    %c0_i32 = arith.constant 0 : i32
    %c0_i32_0 = arith.constant 0 : i32
    %c0_i32_1 = arith.constant 0 : i32
    return %arg0, %c0_i32, %c0_i32_0 : i32, i32, i32
  }
}

</mosaic_0001>

<bundles_post_ra>
// kernel: tpu_custom_call.1
= control target key start
LH: loop header
LB: loop body
LE: loop exit
PB: predicated region body
PF: predicated region fallthrough
CT: control target
= control target key end

     0   :  { %7 = vsyncpa [#allocation3], 0  ;;  %s219_s0 = inlined_call_operand.hbm [shape: f32[16,128], index: 0, kind: input, shape index: {}]   ;;  %s220_s1 = inlined_call_operand.hbm [shape: f32[16,128], index: 1, kind: input, shape index: {}]   ;;  %s221_s2 = inlined_call_operand.hbm [shape: f32[1,8,128], index: 2, kind: output, shape index: {}]  }
   0x1   :  { %8 = vsyncpa [#allocation6], 0 }
   0x2   :  { %9 = vsyncpa [#allocation4], 0  ;;  %s163_s9 = smov [#allocation2]   ;;  %s91_s13 = scalar_lea.hbm %s219_s0, 256 }
   0x3   :  { %s19_s10 = sshll.u32 %s163_s9, 4  ;;  %p92_p0 = scmp.ne.s32.totalorder %s219_s0, %s91_s13  ;;  %s20_s10 = int_to_ptr.vmem [resolvable:$true] %s19_s10 }
   0x4   :  { %p95_p1 = scmp.lt.u32.totalorder %s91_s13, %s219_s0 }
   0x6   :  { %p97_p2 = pnand %p95_p1, %p92_p0 }
   0x8   :  { %100 = shalt.err (!%p97_p2)
}
   0x9   :  { %s101_s18 = scalar_lea.vmem %s20_s10, 256  ;;  %p106_p4 = scmp.lt.s32.totalorder %s20_s10, %s20_s10 }
   0xa   :  { %p102_p3 = scmp.ne.s32.totalorder %s20_s10, %s101_s18  ;;  %p107_p5 = scmp.lt.s32.totalorder %s101_s18, %s101_s18 }
   0xc   :  { %p108_p6 = por %p107_p5, %p106_p4 }
   0xe   :  { %p109_p7 = pnand %p108_p6, %p102_p3 }
  0x10   :  { %112 = shalt.err (!%p109_p7)
}
  0x11   :  { %s164_s19 = smov 128   ;;  %s165_s20 = smov 8  }
  0x12   :  { %25 = dma.hbm_to_vmem [thread:$0]  %s219_s0, 256, %s20_s10, [#allocation3], %s164_s19, %s164_s19, %s165_s20  }
  0x13   :  { %s166_s23 = smov [#allocation5]   ;;  %s113_s27 = scalar_lea.hbm %s220_s1, 256 }
  0x14   :  { %s35_s24 = sshll.u32 %s166_s23, 4  ;;  %p114_p8 = scmp.ne.s32.totalorder %s220_s1, %s113_s27  ;;  %s36_s24 = int_to_ptr.vmem [resolvable:$true] %s35_s24 }
  0x15   :  { %p117_p9 = scmp.lt.u32.totalorder %s113_s27, %s220_s1 }
  0x17   :  { %p119_p10 = pnand %p117_p9, %p114_p8 }
  0x19   :  { %122 = shalt.err (!%p119_p10)
}
  0x1a   :  { %s123_s4 = scalar_lea.vmem %s36_s24, 256  ;;  %p128_p12 = scmp.lt.s32.totalorder %s36_s24, %s36_s24 }
  0x1b   :  { %p124_p11 = scmp.ne.s32.totalorder %s36_s24, %s123_s4  ;;  %p129_p13 = scmp.lt.s32.totalorder %s123_s4, %s123_s4 }
  0x1d   :  { %p130_p0 = por %p129_p13, %p128_p12 }
  0x1f   :  { %p131_p1 = pnand %p130_p0, %p124_p11 }
  0x21   :  { %134 = shalt.err (!%p131_p1)
}
  0x22   :  { %41 = dma.hbm_to_vmem [thread:$0]  %s220_s1, 256, %s36_s24, [#allocation6], %s164_s19, %s164_s19, %s165_s20  }
  0x23   :  { %157 = dma.done.wait [#allocation3], 256  }
  0x24   :  { %158 = vsyncadd [#allocation3], 4294967040 }
  0x25   :  { %159 = dma.done.wait [#allocation6], 256  }
  0x26   :  { %160 = vsyncadd [#allocation6], 4294967040  ;;  %v57_v0 = vld [vmem:[#allocation2] sm:$0xff]  ;;  %v58_v1 = vld [vmem:[#allocation2 + $0x8] sm:$0xff]  ;;  %s167_s6 = smov [#allocation7]  }
  0x27   :  { %v59_v2 = vld [vmem:[#allocation5] sm:$0xff]  ;;  %v60_v3 = vld [vmem:[#allocation5 + $0x8] sm:$0xff]  ;;  %s75_s7 = sshll.u32 %s167_s6, 4  ;;  %s76_s7 = int_to_ptr.vmem [resolvable:$true] %s75_s7 }
  0x28   :  { %v61_v4 = vsub.f32 %v57_v0, %v59_v2  ;;  %v62_v5 = vsub.f32 %v58_v1, %v60_v3  ;;  %s135_s8 = scalar_lea.vmem %s76_s7, 128  ;;  %p140_p3 = scmp.lt.s32.totalorder %s76_s7, %s76_s7 }
  0x29   :  { %p136_p2 = scmp.ne.s32.totalorder %s76_s7, %s135_s8  ;;  %p141_p4 = scmp.lt.s32.totalorder %s135_s8, %s135_s8 }
  0x2a   :  { %v64_v6 = vmul.f32 %v61_v4, %v61_v4  ;;  %v65_v7 = vmul.f32 %v62_v5, %v62_v5 }
  0x2b   :  { %p142_p5 = por %p141_p4, %p140_p3 }
  0x2c   :  { %v66_v8 = vadd.f32 %v65_v7, %v64_v6 }
  0x2d   :  { %p143_p6 = pnand %p142_p5, %p136_p2 }
  0x2e   :  { %68 = vst [vmem:[#allocation7] sm:$0xff] %v66_v8 }
  0x2f   :  { %146 = shalt.err (!%p143_p6)
}
  0x30   :  { %s147_s10 = scalar_lea.hbm %s221_s2, 128 }
  0x31   :  { %p148_p7 = scmp.ne.s32.totalorder %s221_s2, %s147_s10  ;;  %p151_p8 = scmp.lt.u32.totalorder %s147_s10, %s221_s2 }
  0x33   :  { %p153_p9 = pnand %p151_p8, %p148_p7 }
  0x35   :  { %156 = shalt.err (!%p153_p9)
}
  0x36   :  { %78 = dma.vmem_to_hbm [thread:$0]  %s76_s7, 128, %s221_s2, [#allocation4]  }
  0x37   :  { %161 = dma.done.wait [#allocation4], 128  }
  0x38   :  { %162 = vsyncadd [#allocation4], 4294967168 }
  0x39   :  { %82 = vsyncpa [#allocation3], 1 }
  0x3a   :  { %83 = vsyncpa [#allocation6], 1 }
  0x3b   :  { %84 = vsyncpa [#allocation4], 1 }

</bundles_post_ra>
